<compile_context>
chip_gen: v7x
topology: tpu7x:2x2x1
jax: 0.10.0
libtpu: 0.0.40
codegen_flags: <defaults>
</compile_context>

<pallas_src>
import jax
import jax.numpy as jnp
from jax.experimental import pallas as pl
from jax.experimental.pallas import tpu as pltpu


def _net_kernel(x_ref, w1_ref, b1_ref, w2_ref, b2_ref, o_ref):
    # fc1 + ReLU.  x block arrives as f32 (no extra HBM pass in the wrapper);
    # cast to bf16 on the VPU (free under HBM slack) and run the MXU matmul
    # with f32 accumulation.
    x = x_ref[...].astype(jnp.bfloat16)
    w1 = w1_ref[...].astype(jnp.bfloat16)
    h = jnp.dot(x, w1, preferred_element_type=jnp.float32)
    h = jnp.maximum(h + b1_ref[...], 0.0)

    # fc2 -> lane-dense (tb, 128) logits slab.  Padded class columns carry a
    # -1e30 (f32) bias so they never win the max and exp() to exactly 0.
    logits = jnp.dot(h.astype(jnp.bfloat16), w2_ref[...],
                     preferred_element_type=jnp.float32)
    logits = logits + b2_ref[...]

    # log_softmax over the class dim (last axis == PyTorch dim=1).
    # exp in bf16 (EUP bf16 on v6e/v7x halves the pushes for the 128-wide
    # padded lane dim); reduction + log stay in f32.
    m = jnp.max(logits, axis=-1, keepdims=True)
    shifted = logits - m
    p = jnp.exp(shifted.astype(jnp.bfloat16)).astype(jnp.float32)
    lse = jnp.log(jnp.sum(p, axis=-1, keepdims=True))
    o_ref[...] = (shifted - lse).astype(o_ref.dtype)


def _round_up(x, m):
    return ((x + m - 1) // m) * m


def _choose_tb(B, tb):
    # Multiple of 32 keeps bf16 sublane packing native ((16,128) min tile).
    tb = max(32, min(tb, _round_up(B, 32)))
    # v7x megacore: make sure there are >= 2 grid steps when the batch is big
    # enough to split, so both TensorCores get work (no-op cost on v5e/v6e).
    if B >= 64 and pl.cdiv(B, tb) < 2:
        tb = max(32, _round_up(pl.cdiv(B, 2), 32))
    return tb


def net_forward(x, w1, b1, w2, b2, *, tb=2048):
    """x: (B, 784) f32.  w1: (784, 32), b1: (1, 32) or (32,),
    w2: (32, 10), b2: (1, 10) or (10,).  Returns (B, 10) log-probabilities
    (f32 interface; internal matmul/exp/store precision is bf16-limited)."""
    B, K = x.shape
    H = w1.shape[1]          # 32
    C = w2.shape[1]          # 10
    CP = 128                 # lane-dense padded class dim

    # Tiny one-time prep of the small resident operands only.  x is passed
    # straight through (f32 in HBM, cast in-kernel).
    w2p = jnp.zeros((H, CP), jnp.bfloat16).at[:, :C].set(w2.astype(jnp.bfloat16))
    b2p = jnp.full((1, CP), -1e30, jnp.float32).at[:, :C].set(
        b2.reshape(1, C).astype(jnp.float32))
    b1r = b1.reshape(1, H).astype(jnp.float32)

    # Batch tiling: no jnp.pad.  The last block may be partial; its undefined
    # rows never feed a cross-row reduction and are never written back.
    tb = _choose_tb(B, tb)
    nb = pl.cdiv(B, tb)

    out = pl.pallas_call(
        _net_kernel,
        out_shape=jax.ShapeDtypeStruct((B, CP), jnp.bfloat16),
        grid=(nb,),
        in_specs=[
            pl.BlockSpec((tb, K), lambda i: (i, 0)),   # x (f32): tiled over batch
            pl.BlockSpec((K, H), lambda i: (0, 0)),    # w1: resident in VMEM
            pl.BlockSpec((1, H), lambda i: (0, 0)),    # b1: resident
            pl.BlockSpec((H, CP), lambda i: (0, 0)),   # w2 (padded): resident
            pl.BlockSpec((1, CP), lambda i: (0, 0)),   # b2 (padded, f32): resident
        ],
        out_specs=pl.BlockSpec((tb, CP), lambda i: (i, 0)),
        compiler_params=pltpu.CompilerParams(
            dimension_semantics=("parallel",),     # shard batch grid over TCs (v7x)
            vmem_limit_bytes=32 * 1024 * 1024,     # ~14 MiB used at tb=2048
        ),
        cost_estimate=pl.CostEstimate(
            flops=2 * B * (K * H + H * CP),
            transcendentals=B * CP,
            bytes_accessed=(x.size * 4 + w1.size * 4 + w2p.size * 2
                            + b1r.size * 4 + b2p.size * 4 + B * CP * 2),
        ),
    )(x, w1, b1r, w2p, b2p)

    # Cheap slice of the lane-dense slab back to the (B, 10) f32 interface.
    return out[:, :C].astype(jnp.float32)


def init_params(key):
    """Deterministic init mimicking nn.Linear's U(-1/sqrt(fan_in), 1/sqrt(fan_in))."""
    k1, k2, k3, k4 = jax.random.split(key, 4)
    bound1 = 1.0 / jnp.sqrt(784.0)
    bound2 = 1.0 / jnp.sqrt(32.0)
    w1 = jax.random.uniform(k1, (784, 32), jnp.float32, -bound1, bound1)
    b1 = jax.random.uniform(k2, (1, 32), jnp.float32, -bound1, bound1)
    w2 = jax.random.uniform(k3, (32, 10), jnp.float32, -bound2, bound2)
    b2 = jax.random.uniform(k4, (1, 10), jnp.float32, -bound2, bound2)
    return w1, b1, w2, b2


def _reference(x, w1, b1, w2, b2):
    h = jnp.maximum(x @ w1 + b1, 0.0)
    return jax.nn.log_softmax(h @ w2 + b2, axis=1)


if __name__ == "__main__":
    key = jax.random.PRNGKey(0)
    kx, kp = jax.random.split(key)
    w1, b1, w2, b2 = init_params(kp)

    # bf16 matmul inputs / exp / output store -> loose tolerance vs f32 ref.
    TOL = 7.5e-2

    # Small-batch case (single, partial grid block).
    B = 8
    x = jax.random.normal(kx, (B, 784), dtype=jnp.float32)
    out = jax.block_until_ready(net_forward(x, w1, b1, w2, b2))
    ref = _reference(x, w1, b1, w2, b2)
    assert out.shape == (B, 10)
    assert bool(jnp.all(jnp.isfinite(out)))
    assert jnp.allclose(out, ref, atol=TOL, rtol=0.0), float(
        jnp.max(jnp.abs(out - ref)))

    # Ragged batch, single partial block (B not a multiple of 32).
    B2 = 20
    x2 = jax.random.normal(jax.random.PRNGKey(1), (B2, 784), dtype=jnp.float32)
    out2 = jax.block_until_ready(net_forward(x2, w1, b1, w2, b2))
    ref2 = _reference(x2, w1, b1, w2, b2)
    assert out2.shape == (B2, 10)
    assert jnp.allclose(out2, ref2, atol=TOL, rtol=0.0), float(
        jnp.max(jnp.abs(out2 - ref2)))

    # Multi-step grid with a partial last block (100 = 3*32 + 4) -- also
    # exercises the nb >= 2 / megacore path via the forced small tile.
    B3 = 100
    x3 = jax.random.normal(jax.random.PRNGKey(2), (B3, 784), dtype=jnp.float32)
    out3 = jax.block_until_ready(net_forward(x3, w1, b1, w2, b2, tb=32))
    ref3 = _reference(x3, w1, b1, w2, b2)
    assert out3.shape == (B3, 10)
    assert jnp.allclose(out3, ref3, atol=TOL, rtol=0.0), float(
        jnp.max(jnp.abs(out3 - ref3)))

    print("KERNEL_OK")
</pallas_src>

<mosaic_0001>
module attributes {stable_mosaic.version = 11 : i64} {
  func.func @_net_kernel(%arg0: i32, %arg1: memref<32x784xf32, #tpu.memory_space<vmem>>, %arg2: memref<784x32xf32, #tpu.memory_space<vmem>>, %arg3: memref<1x32xf32, #tpu.memory_space<vmem>>, %arg4: memref<32x128xbf16, #tpu.memory_space<vmem>>, %arg5: memref<1x128xf32, #tpu.memory_space<vmem>>, %arg6: memref<32x128xbf16, #tpu.memory_space<vmem>>) attributes {dimension_semantics = [#tpu.dimension_semantics<parallel>], iteration_bounds = array<i64: 1>, scalar_prefetch = 0 : i64, scratch_operands = 0 : i64, tpu.core_type = #tpu.core_type<tc>, window_params = [{transform_indices = @transform_0, window_bounds = array<i64: 32, 784>}, {pipeline_mode = #tpu.pipeline_mode<synchronous>, transform_indices = @transform_1, window_bounds = array<i64: 784, 32>}, {pipeline_mode = #tpu.pipeline_mode<synchronous>, transform_indices = @transform_2, window_bounds = array<i64: 1, 32>}, {pipeline_mode = #tpu.pipeline_mode<synchronous>, transform_indices = @transform_3, window_bounds = array<i64: 32, 128>}, {pipeline_mode = #tpu.pipeline_mode<synchronous>, transform_indices = @transform_4, window_bounds = array<i64: 1, 128>}, {transform_indices = @transform_5, window_bounds = array<i64: 32, 128>}]} {
    %c0 = arith.constant 0 : index
    %c0_0 = arith.constant 0 : index
    %0 = vector.load %arg1[%c0, %c0_0] : memref<32x784xf32, #tpu.memory_space<vmem>>, vector<32x784xf32>
    %1 = arith.truncf %0 : vector<32x784xf32> to vector<32x784xbf16>
    %c0_1 = arith.constant 0 : index
    %c0_2 = arith.constant 0 : index
    %2 = vector.load %arg2[%c0_1, %c0_2] : memref<784x32xf32, #tpu.memory_space<vmem>>, vector<784x32xf32>
    %3 = arith.truncf %2 : vector<784x32xf32> to vector<784x32xbf16>
    %cst = arith.constant dense<0.000000e+00> : vector<32x32xf32>
    %4 = tpu.matmul %1, %3, %cst {dimension_numbers = #tpu.dot_dimension_numbers<[1], [0], [0], [1], [0, 0, 1, 1], [], []>} : vector<32x784xbf16>, vector<784x32xbf16>, vector<32x32xf32> -> vector<32x32xf32>
    %c0_3 = arith.constant 0 : index
    %c0_4 = arith.constant 0 : index
    %5 = vector.load %arg3[%c0_3, %c0_4] : memref<1x32xf32, #tpu.memory_space<vmem>>, vector<1x32xf32>
    %6 = vector.broadcast %5 : vector<1x32xf32> to vector<32x32xf32>
    %7 = arith.addf %4, %6 : vector<32x32xf32>
    %cst_5 = arith.constant 0.000000e+00 : f32
    %8 = vector.broadcast %cst_5 : f32 to vector<32x32xf32>
    %9 = arith.maximumf %7, %8 : vector<32x32xf32>
    %10 = arith.truncf %9 : vector<32x32xf32> to vector<32x32xbf16>
    %c0_6 = arith.constant 0 : index
    %c0_7 = arith.constant 0 : index
    %11 = vector.load %arg4[%c0_6, %c0_7] : memref<32x128xbf16, #tpu.memory_space<vmem>>, vector<32x128xbf16>
    %cst_8 = arith.constant dense<0.000000e+00> : vector<32x128xf32>
    %12 = tpu.matmul %10, %11, %cst_8 {dimension_numbers = #tpu.dot_dimension_numbers<[1], [0], [0], [1], [0, 0, 1, 1], [], []>} : vector<32x32xbf16>, vector<32x128xbf16>, vector<32x128xf32> -> vector<32x128xf32>
    %c0_9 = arith.constant 0 : index
    %c0_10 = arith.constant 0 : index
    %13 = vector.load %arg5[%c0_9, %c0_10] : memref<1x128xf32, #tpu.memory_space<vmem>>, vector<1x128xf32>
    %14 = vector.broadcast %13 : vector<1x128xf32> to vector<32x128xf32>
    %15 = arith.addf %12, %14 : vector<32x128xf32>
    %cst_11 = arith.constant dense<0xFF800000> : vector<32xf32>
    %16 = vector.multi_reduction <maximumf>, %15, %cst_11 [1] : vector<32x128xf32> to vector<32xf32>
    %17 = vector.shape_cast %16 : vector<32xf32> to vector<32x1xf32>
    %18 = vector.broadcast %17 : vector<32x1xf32> to vector<32x128xf32>
    %19 = arith.subf %15, %18 : vector<32x128xf32>
    %20 = arith.truncf %19 : vector<32x128xf32> to vector<32x128xbf16>
    %21 = math.exp %20 : vector<32x128xbf16>
    %22 = arith.extf %21 : vector<32x128xbf16> to vector<32x128xf32>
    %cst_12 = arith.constant dense<0.000000e+00> : vector<32xf32>
    %23 = vector.multi_reduction <add>, %22, %cst_12 [1] : vector<32x128xf32> to vector<32xf32>
    %24 = vector.shape_cast %23 : vector<32xf32> to vector<32x1xf32>
    %25 = math.log %24 : vector<32x1xf32>
    %26 = vector.broadcast %25 : vector<32x1xf32> to vector<32x128xf32>
    %27 = arith.subf %19, %26 : vector<32x128xf32>
    %28 = arith.truncf %27 : vector<32x128xf32> to vector<32x128xbf16>
    %c0_13 = arith.constant 0 : index
    %c0_14 = arith.constant 0 : index
    %29 = vector.load %arg6[%c0_13, %c0_14] : memref<32x128xbf16, #tpu.memory_space<vmem>>, vector<32x128xbf16>
    tpu.vector_store %arg6[%c0_13, %c0_14], %28 {strides = array<i32>} : memref<32x128xbf16, #tpu.memory_space<vmem>>, vector<32x128xbf16>,
    return
  }
  func.func @transform_0(%arg0: i32) -> (i32, i32) {
    %c0_i32 = arith.constant 0 : i32
    %c0_i32_0 = arith.constant 0 : i32
    return %arg0, %c0_i32 : i32, i32
  }
  func.func @transform_1(%arg0: i32) -> (i32, i32) {
    %c0_i32 = arith.constant 0 : i32
    %c0_i32_0 = arith.constant 0 : i32
    %c0_i32_1 = arith.constant 0 : i32
    return %c0_i32, %c0_i32_0 : i32, i32
  }
  func.func @transform_2(%arg0: i32) -> (i32, i32) {
    %c0_i32 = arith.constant 0 : i32
    %c0_i32_0 = arith.constant 0 : i32
    %c0_i32_1 = arith.constant 0 : i32
    return %c0_i32, %c0_i32_0 : i32, i32
  }
  func.func @transform_3(%arg0: i32) -> (i32, i32) {
    %c0_i32 = arith.constant 0 : i32
    %c0_i32_0 = arith.constant 0 : i32
    %c0_i32_1 = arith.constant 0 : i32
    return %c0_i32, %c0_i32_0 : i32, i32
  }
  func.func @transform_4(%arg0: i32) -> (i32, i32) {
    %c0_i32 = arith.constant 0 : i32
    %c0_i32_0 = arith.constant 0 : i32
    %c0_i32_1 = arith.constant 0 : i32
    return %c0_i32, %c0_i32_0 : i32, i32
  }
  func.func @transform_5(%arg0: i32) -> (i32, i32) {
    %c0_i32 = arith.constant 0 : i32
    %c0_i32_0 = arith.constant 0 : i32
    return %arg0, %c0_i32 : i32, i32
  }
}

</mosaic_0001>

<bundles_post_ra>
// kernel: tpu_custom_call.1
= control target key start
LH: loop header
LB: loop body
LE: loop exit
PB: predicated region body
PF: predicated region fallthrough
CT: control target
= control target key end

     0   :  { %10 = vsyncpa [#allocation3], 0  ;;  %vm218_vm0 = vcmask 130048   ;;  %vm450_vm1 = vcmask 261120   ;;  %s1196_s0 = inlined_call_operand.vmem [shape: f32[8,784], index: 0, kind: input, shape index: {}]   ;;  %s1197_s1 = inlined_call_operand.vmem [shape: f32[784,32], index: 1, kind: input, shape index: {}]   ;;  %s1198_s2 = inlined_call_operand.vmem [shape: f32[1,32], index: 2, kind: input, shape index: {}]   ;;  %s1199_s3 = inlined_call_operand.vmem [shape: bf16[32,128], index: 3, kind: input, shape index: {}]   ;;  %s1200_s4 = inlined_call_operand.vmem [shape: f32[1,128], index: 4, kind: input, shape index: {}]   ;;  %s1201_s5 = inlined_call_operand.hbm [shape: bf16[8,128], index: 5, kind: output, shape index: {}]  }
   0x1   :  { %v80_v0 = vld [vmem:[%s1197_s1 + $0x80] sm:$0xff]  ;;  %v81_v1 = vld [vmem:[%s1197_s1 + $0x88] sm:$0xff]  ;;  %v82_v12 = vld [vmem:[%s1197_s1 + $0x90] sm:$0xff] }
   0x2   :  { %v170_v2 = vpack.c.bf16 %v81_v1, %v80_v0  ;;  %v64_v3 = vld [vmem:[%s1197_s1] sm:$0xff]  ;;  %v65_v4 = vld [vmem:[%s1197_s1 + $0x8] sm:$0xff]  ;;  %v83_v13 = vld [vmem:[%s1197_s1 + $0x98] sm:$0xff] }
   0x3   :  { %v112_v5 = vld [vmem:[%s1197_s1 + $0x180] sm:$0xff]  ;;  %v162_v6 = vpack.c.bf16 %v65_v4, %v64_v3  ;;  %v113_v7 = vld [vmem:[%s1197_s1 + $0x188] sm:$0xff]  ;;  %v66_v14 = vld [vmem:[%s1197_s1 + $0x10] sm:$0xff]  ;;  %v171_v15 = vpack.c.bf16 %v83_v13, %v82_v12 }
   0x4   :  { %v96_v8 = vld [vmem:[%s1197_s1 + $0x100] sm:$0xff]  ;;  %v97_v9 = vld [vmem:[%s1197_s1 + $0x108] sm:$0xff]  ;;  %613 = vmatprep.subr.bf16.mxu0 %v170_v2  ;;  %v186_v10 = vpack.c.bf16 %v113_v7, %v112_v5  ;;  %v67_v16 = vld [vmem:[%s1197_s1 + $0x18] sm:$0xff] }
   0x5   :  { %v178_v11 = vpack.c.bf16 %v97_v9, %v96_v8  ;;  %614 = vmatpush3.bf16.msra.mxu0 %v162_v6  ;;  %v114_v17 = vld [vmem:[%s1197_s1 + $0x190] sm:$0xff]  ;;  %v115_v18 = vld [vmem:[%s1197_s1 + $0x198] sm:$0xff]  ;;  %v163_v19 = vpack.c.bf16 %v67_v16, %v66_v14  ;;  %v84_v23 = vld [vmem:[%s1197_s1 + $0xa0] sm:$0xff] }
   0x6   :  { %641 = vmatprep.subr.bf16.mxu1 %v186_v10  ;;  %v187_v20 = vpack.c.bf16 %v115_v18, %v114_v17  ;;  %v98_v21 = vld [vmem:[%s1197_s1 + $0x110] sm:$0xff]  ;;  %v99_v22 = vld [vmem:[%s1197_s1 + $0x118] sm:$0xff]  ;;  %615 = vmatprep.subr.bf16.mxu0 %v171_v15  ;;  %v85_v25 = vld [vmem:[%s1197_s1 + $0xa8] sm:$0xff] }
   0x7   :  { %642 = vmatpush3.bf16.msra.mxu1 %v178_v11  ;;  %v179_v24 = vpack.c.bf16 %v99_v22, %v98_v21  ;;  %v68_v26 = vld [vmem:[%s1197_s1 + $0x20] sm:$0xff]  ;;  %v69_v27 = vld [vmem:[%s1197_s1 + $0x28] sm:$0xff]  ;;  %v172_v28 = vpack.c.bf16 %v85_v25, %v84_v23  ;;  %v86_v35 = vld [vmem:[%s1197_s1 + $0xb0] sm:$0xff] }
   0x8   :  { %643 = vmatprep.subr.bf16.mxu1 %v187_v20  ;;  %v116_v29 = vld [vmem:[%s1197_s1 + $0x1a0] sm:$0xff]  ;;  %v117_v30 = vld [vmem:[%s1197_s1 + $0x1a8] sm:$0xff]  ;;  %v164_v32 = vpack.c.bf16 %v69_v27, %v68_v26  ;;  %v87_v36 = vld [vmem:[%s1197_s1 + $0xb8] sm:$0xff] }
   0x9   :  { %v100_v31 = vld [vmem:[%s1197_s1 + $0x120] sm:$0xff]  ;;  %616 = vmatpush3.bf16.msra.mxu0 %v163_v19  ;;  %v188_v33 = vpack.c.bf16 %v117_v30, %v116_v29  ;;  %v101_v34 = vld [vmem:[%s1197_s1 + $0x128] sm:$0xff]  ;;  %v173_v37 = vpack.c.bf16 %v87_v36, %v86_v35  ;;  %v70_v38 = vld [vmem:[%s1197_s1 + $0x30] sm:$0xff] }
   0xa   :  { %617 = vmatprep.subr.bf16.mxu0 %v172_v28  ;;  %v71_v39 = vld [vmem:[%s1197_s1 + $0x38] sm:$0xff]  ;;  %v118_v40 = vld [vmem:[%s1197_s1 + $0x1b0] sm:$0xff]  ;;  %v180_v41 = vpack.c.bf16 %v101_v34, %v100_v31  ;;  %v88_v46 = vld [vmem:[%s1197_s1 + $0xc0] sm:$0xff] }
   0xb   :  { %644 = vmatpush3.bf16.msra.mxu1 %v179_v24  ;;  %v119_v42 = vld [vmem:[%s1197_s1 + $0x1b8] sm:$0xff]  ;;  %v102_v43 = vld [vmem:[%s1197_s1 + $0x130] sm:$0xff]  ;;  %v89_v47 = vld [vmem:[%s1197_s1 + $0xc8] sm:$0xff]  ;;  %v165_v48 = vpack.c.bf16 %v71_v39, %v70_v38 }
   0xc   :  { %645 = vmatprep.subr.bf16.mxu1 %v188_v33  ;;  %v189_v44 = vpack.c.bf16 %v119_v42, %v118_v40  ;;  %v103_v45 = vld [vmem:[%s1197_s1 + $0x138] sm:$0xff]  ;;  %v120_v49 = vld [vmem:[%s1197_s1 + $0x1c0] sm:$0xff]  ;;  %v121_v50 = vld [vmem:[%s1197_s1 + $0x1c8] sm:$0xff]  ;;  %v174_v51 = vpack.c.bf16 %v89_v47, %v88_v46 }
   0xd   :  { %618 = vmatpush3.bf16.msra.mxu0 %v164_v32  ;;  %v72_v52 = vld [vmem:[%s1197_s1 + $0x40] sm:$0xff]  ;;  %v73_v53 = vld [vmem:[%s1197_s1 + $0x48] sm:$0xff]  ;;  %v181_v54 = vpack.c.bf16 %v103_v45, %v102_v43  ;;  %v90_v55 = vld [vmem:[%s1197_s1 + $0xd0] sm:$0xff]  ;;  %v190_v57 = vpack.c.bf16 %v121_v50, %v120_v49 }
   0xe   :  { %619 = vmatprep.subr.bf16.mxu0 %v173_v37  ;;  %v91_v56 = vld [vmem:[%s1197_s1 + $0xd8] sm:$0xff]  ;;  %v104_v58 = vld [vmem:[%s1197_s1 + $0x140] sm:$0xff]  ;;  %v105_v59 = vld [vmem:[%s1197_s1 + $0x148] sm:$0xff]  ;;  %v166_v60 = vpack.c.bf16 %v73_v53, %v72_v52 }
   0xf   :  { %646 = vmatpush3.bf16.msra.mxu1 %v180_v41  ;;  %v122_v61 = vld [vmem:[%s1197_s1 + $0x1d0] sm:$0xff]  ;;  %v123_v62 = vld [vmem:[%s1197_s1 + $0x1d8] sm:$0xff]  ;;  %v175_v63 = vpack.c.bf16 %v91_v56, %v90_v55  ;;  %v182_v2 = vpack.c.bf16 %v105_v59, %v104_v58  ;;  %v92_v3 = vld [vmem:[%s1197_s1 + $0xe0] sm:$0xff] }
  0x10   :  { %647 = vmatprep.subr.bf16.mxu1 %v189_v44  ;;  %v74_v0 = vld [vmem:[%s1197_s1 + $0x50] sm:$0xff]  ;;  %v75_v1 = vld [vmem:[%s1197_s1 + $0x58] sm:$0xff]  ;;  %v93_v4 = vld [vmem:[%s1197_s1 + $0xe8] sm:$0xff]  ;;  %v191_v5 = vpack.c.bf16 %v123_v62, %v122_v61 }
  0x11   :  { %620 = vmatpush3.bf16.msra.mxu0 %v165_v48  ;;  %v106_v6 = vld [vmem:[%s1197_s1 + $0x150] sm:$0xff]  ;;  %v107_v7 = vld [vmem:[%s1197_s1 + $0x158] sm:$0xff]  ;;  %v167_v8 = vpack.c.bf16 %v75_v1, %v74_v0  ;;  %v76_v9 = vld [vmem:[%s1197_s1 + $0x60] sm:$0xff]  ;;  %v176_v12 = vpack.c.bf16 %v93_v4, %v92_v3 }
  0x12   :  { %621 = vmatprep.subr.bf16.mxu0 %v174_v51  ;;  %v124_v10 = vld [vmem:[%s1197_s1 + $0x1e0] sm:$0xff]  ;;  %v125_v11 = vld [vmem:[%s1197_s1 + $0x1e8] sm:$0xff]  ;;  %v183_v16 = vpack.c.bf16 %v107_v7, %v106_v6  ;;  %v94_v17 = vld [vmem:[%s1197_s1 + $0xf0] sm:$0xff] }
  0x13   :  { %648 = vmatpush3.bf16.msra.mxu1 %v181_v54  ;;  %v77_v13 = vld [vmem:[%s1197_s1 + $0x68] sm:$0xff]  ;;  %v30_v15 = vld [vmem:[%s1196_s0 + $0x40] sm:$0xff]  ;;  %v95_v18 = vld [vmem:[%s1197_s1 + $0xf8] sm:$0xff]  ;;  %v192_v20 = vpack.c.bf16 %v125_v11, %v124_v10 }
  0x14   :  { %649 = vmatprep.subr.bf16.mxu1 %v190_v57  ;;  %v23_v14 = vld [vmem:[%s1196_s0 + $0x8] sm:$0xff]  ;;  %v108_v21 = vld [vmem:[%s1197_s1 + $0x160] sm:$0xff]  ;;  %v25_v23 = vld [vmem:[%s1196_s0 + $0x18] sm:$0xff]  ;;  %v168_v24 = vpack.c.bf16 %v77_v13, %v76_v9  ;;  %v177_v28 = vpack.c.bf16 %v95_v18, %v94_v17 }
  0x15   :  { %622 = vmatpush3.bf16.msra.mxu0 %v166_v60  ;;  %v51_v19 = vpack.c.bf16 %v30_v15, %v23_v14  ;;  %v109_v22 = vld [vmem:[%s1197_s1 + $0x168] sm:$0xff]  ;;  %v126_v25 = vld [vmem:[%s1197_s1 + $0x1f0] sm:$0xff]  ;;  %v127_v26 = vld [vmem:[%s1197_s1 + $0x1f8] sm:$0xff] }
  0x16   :  { %623 = vmatprep.subr.bf16.mxu0 %v175_v63  ;;  %v32_v27 = vld [vmem:[%s1196_s0 + $0x50] sm:$0xff]  ;;  %v79_v30 = vld [vmem:[%s1197_s1 + $0x78] sm:$0xff]  ;;  %v184_v32 = vpack.c.bf16 %v109_v22, %v108_v21  ;;  %v144_v33 = vld [vmem:[%s1197_s1 + $0x280] sm:$0xff]  ;;  %v193_v35 = vpack.c.bf16 %v127_v26, %v126_v25 }
  0x17   :  { %650 = vmatpush3.bf16.msra.mxu1 %v182_v2  ;;  %257 = vmatprep.mubr.bf16.mxu0 %v51_v19  ;;  %v78_v29 = vld [vmem:[%s1197_s1 + $0x70] sm:$0xff]  ;;  %v53_v31 = vpack.c.bf16 %v32_v27, %v25_v23  ;;  %v145_v34 = vld [vmem:[%s1197_s1 + $0x288] sm:$0xff]  ;;  %v111_v37 = vld [vmem:[%s1197_s1 + $0x178] sm:$0xff] }
  0x18   :  { %651 = vmatprep.subr.bf16.mxu1 %v191_v5  ;;  %v110_v36 = vld [vmem:[%s1197_s1 + $0x170] sm:$0xff]  ;;  %v169_v38 = vpack.c.bf16 %v79_v30, %v78_v29  ;;  %v22_v39 = vld [vmem:[%s1196_s0] sm:$0xff]  ;;  %v29_v40 = vld [vmem:[%s1196_s0 + $0x38] sm:$0xff]  ;;  %v202_v41 = vpack.c.bf16 %v145_v34, %v144_v33 }
  0x19   :  { %624 = vmatpush3.bf16.msra.mxu0 %v167_v8  ;;  %306 = vmatprep.mubr.bf16.mxu1 %v53_v31  ;;  %v128_v42 = vld [vmem:[%s1197_s1 + $0x200] sm:$0xff]  ;;  %v129_v43 = vld [vmem:[%s1197_s1 + $0x208] sm:$0xff]  ;;  %v24_v44 = vld [vmem:[%s1196_s0 + $0x10] sm:$0xff]  ;;  %v185_v45 = vpack.c.bf16 %v111_v37, %v110_v36  ;;  %v50_v49 = vpack.c.bf16 %v29_v40, %v22_v39 }
  0x1a   :  { %625 = vmatprep.subr.bf16.mxu0 %v176_v12  ;;  %v31_v46 = vld [vmem:[%s1196_s0 + $0x48] sm:$0xff]  ;;  %v146_v47 = vld [vmem:[%s1197_s1 + $0x290] sm:$0xff]  ;;  %v147_v48 = vld [vmem:[%s1197_s1 + $0x298] sm:$0xff]  ;;  %v194_v52 = vpack.c.bf16 %v129_v43, %v128_v42 }
  0x1b   :  { %652 = vmatpush3.bf16.msra.mxu1 %v183_v16  ;;  %v37_v50 = vld [vmem:[%s1196_s0 + $0x78] sm:$0xff]  ;;  %v44_v51 = vld [vmem:[%s1196_s0 + $0xb0] sm:$0xff]  ;;  %v52_v54 = vpack.c.bf16 %v31_v46, %v24_v44  ;;  %v203_v55 = vpack.c.bf16 %v147_v48, %v146_v47  ;;  %v39_v58 = vld [vmem:[%s1196_s0 + $0x88] sm:$0xff] }
  0x1c   :  { %653 = vmatprep.subr.bf16.mxu1 %v192_v20  ;;  %v58_v53 = vpack.c.bf16 %v44_v51, %v37_v50  ;;  %v130_v56 = vld [vmem:[%s1197_s1 + $0x210] sm:$0xff]  ;;  %v131_v57 = vld [vmem:[%s1197_s1 + $0x218] sm:$0xff]  ;;  %v148_v59 = vld [vmem:[%s1197_s1 + $0x2a0] sm:$0xff] }
  0x1d   :  { %626 = vmatpush3.bf16.msra.mxu0 %v168_v24  ;;  %v149_v60 = vld [vmem:[%s1197_s1 + $0x2a8] sm:$0xff]  ;;  %v46_v61 = vld [vmem:[%s1196_s0 + $0xc0] sm:$0xff]  ;;  %v36_v0 = vld [vmem:[%s1196_s0 + $0x70] sm:$0xff]  ;;  %v195_v2 = vpack.c.bf16 %v131_v57, %v130_v56 }
  0x1e   :  { %627 = vmatprep.subr.bf16.mxu0 %v177_v28  ;;  %v132_v62 = vld [vmem:[%s1197_s1 + $0x220] sm:$0xff]  ;;  %v133_v63 = vld [vmem:[%s1197_s1 + $0x228] sm:$0xff]  ;;  %v60_v1 = vpack.c.bf16 %v46_v61, %v39_v58  ;;  %v204_v6 = vpack.c.bf16 %v149_v60, %v148_v59  ;;  %v150_v7 = vld [vmem:[%s1197_s1 + $0x2b0] sm:$0xff] }
  0x1f   :  { %654 = vmatpush3.bf16.msra.mxu1 %v184_v32  ;;  %v43_v3 = vld [vmem:[%s1196_s0 + $0xa8] sm:$0xff]  ;;  %v160_v4 = vld [vmem:[%s1197_s1 + $0x300] sm:$0xff]  ;;  %v151_v8 = vld [vmem:[%s1197_s1 + $0x2b8] sm:$0xff]  ;;  %v196_v16 = vpack.c.bf16 %v133_v63, %v132_v62 }
  0x20   :  { %655 = vmatprep.subr.bf16.mxu1 %v193_v35  ;;  %v161_v5 = vld [vmem:[%s1197_s1 + $0x308] sm:$0xff]  ;;  %v38_v9 = vld [vmem:[%s1196_s0 + $0x80] sm:$0xff]  ;;  %v45_v11 = vld [vmem:[%s1196_s0 + $0xb8] sm:$0xff]  ;;  %v57_v14 = vpack.c.bf16 %v43_v3, %v36_v0  ;;  %v205_v19 = vpack.c.bf16 %v151_v8, %v150_v7 }
  0x21   :  { %628 = vmatpush3.bf16.msra.mxu0 %v169_v38  ;;  %v210_v10 = vpack.c.bf16 %v161_v5, %v160_v4  ;;  %v27_v12 = vld [vmem:[%s1196_s0 + $0x28] sm:$0xff]  ;;  %v34_v13 = vld [vmem:[%s1196_s0 + $0x60] sm:$0xff]  ;;  %v28_v15 = vld [vmem:[%s1196_s0 + $0x30] sm:$0xff]  ;;  %v59_v23 = vpack.c.bf16 %v45_v11, %v38_v9 }
  0x22   :  { %669 = vmatprep.subr.bf16.mxu0 %v202_v41  ;;  %v55_v17 = vpack.c.bf16 %v34_v13, %v27_v12  ;;  %v35_v18 = vld [vmem:[%s1196_s0 + $0x68] sm:$0xff]  ;;  %v134_v20 = vld [vmem:[%s1197_s1 + $0x230] sm:$0xff]  ;;  %v135_v21 = vld [vmem:[%s1197_s1 + $0x238] sm:$0xff] }
  0x23   :  { %656 = vmatpush3.bf16.msra.mxu1 %v185_v45  ;;  %v152_v22 = vld [vmem:[%s1197_s1 + $0x2c0] sm:$0xff]  ;;  %v153_v24 = vld [vmem:[%s1197_s1 + $0x2c8] sm:$0xff]  ;;  %v56_v25 = vpack.c.bf16 %v35_v18, %v28_v15  ;;  %v197_v26 = vpack.c.bf16 %v135_v21, %v134_v20  ;;  %v154_v30 = vld [vmem:[%s1197_s1 + $0x2d0] sm:$0xff] }
  0x24   :  { %258 = vmatmul.mubr.bf16.vlgmr.msra.gmra.mrb[0].mxu0 %v50_v49  ;;  %704 = vmatprep.subr.bf16.mxu1 %v210_v10  ;;  %v206_v27 = vpack.c.bf16 %v153_v24, %v152_v22  ;;  %v136_v28 = vld [vmem:[%s1197_s1 + $0x240] sm:$0xff]  ;;  %v137_v29 = vld [vmem:[%s1197_s1 + $0x248] sm:$0xff]  ;;  %v155_v31 = vld [vmem:[%s1197_s1 + $0x2d8] sm:$0xff] }
  0x25   :  { %670 = vmatpush3.bf16.msra.mxu0 %v194_v52  ;;  %265 = vmatprep.mubr.bf16.mxu0 %v58_v53  ;;  %v42_v32 = vld [vmem:[%s1196_s0 + $0xa0] sm:$0xff]  ;;  %v49_v33 = vld [vmem:[%s1196_s0 + $0xd8] sm:$0xff]  ;;  %v198_v34 = vpack.c.bf16 %v137_v29, %v136_v28  ;;  %v207_v35 = vpack.c.bf16 %v155_v31, %v154_v30  ;;  %v138_v36 = vld [vmem:[%s1197_s1 + $0x250] sm:$0xff] }
  0x26   :  { %307 = vmatmul.mubr.bf16.vlgmr.msra.gmra.mrb[0].mxu1 %v52_v54  ;;  %671 = vmatprep.subr.bf16.mxu0 %v203_v55  ;;  %v139_v37 = vld [vmem:[%s1197_s1 + $0x258] sm:$0xff]  ;;  %v63_v38 = vpack.c.bf16 %v49_v33, %v42_v32  ;;  %v156_v39 = vld [vmem:[%s1197_s1 + $0x2e0] sm:$0xff]  ;;  %v157_v40 = vld [vmem:[%s1197_s1 + $0x2e8] sm:$0xff] }
  0x27   :  { %314 = vmatprep.mubr.bf16.mxu1 %v60_v1  ;;  %705 = vmatpush3.bf16.msra.mxu1 %v210_v10  ;;  %v199_v41 = vpack.c.bf16 %v139_v37, %v138_v36  ;;  %v208_v42 = vpack.c.bf16 %v157_v40, %v156_v39  ;;  %v140_v43 = vld [vmem:[%s1197_s1 + $0x260] sm:$0xff]  ;;  %v141_v44 = vld [vmem:[%s1197_s1 + $0x268] sm:$0xff]  ;;  %v158_v45 = vld [vmem:[%s1197_s1 + $0x2f0] sm:$0xff] }
  0x28   :  { %v159_v46 = vld [vmem:[%s1197_s1 + $0x2f8] sm:$0xff]  ;;  %v200_v47 = vpack.c.bf16 %v141_v44, %v140_v43  ;;  %v142_v49 = vld [vmem:[%s1197_s1 + $0x270] sm:$0xff]  ;;  %v26_v52 = vld [vmem:[%s1196_s0 + $0x20] sm:$0xff] }
  0x29   :  { %672 = vmatpush3.bf16.msra.mxu0 %v195_v2  ;;  %v209_v48 = vpack.c.bf16 %v159_v46, %v158_v45  ;;  %v143_v50 = vld [vmem:[%s1197_s1 + $0x278] sm:$0xff]  ;;  %v48_v55 = vld [vmem:[%s1196_s0 + $0xd0] sm:$0xff]  ;;  %v47_v59 = vld [vmem:[%s1196_s0 + $0xc8] sm:$0xff] }
  0x2a   :  { %673 = vmatprep.subr.bf16.mxu0 %v204_v6  ;;  %v201_v51 = vpack.c.bf16 %v143_v50, %v142_v49  ;;  %v33_v53 = vld [vmem:[%s1196_s0 + $0x58] sm:$0xff]  ;;  %v40_v58 = vld [vmem:[%s1196_s0 + $0x90] sm:$0xff]  ;;  %v721_v61 = vld [vmem:[%s1199_s3] sm:$0xff]  }
  0x2b   :  { %v41_v54 = vld [vmem:[%s1196_s0 + $0x98] sm:$0xff]  ;;  %v54_v56 = vpack.c.bf16 %v33_v53, %v26_v52  ;;  %v61_v60 = vpack.c.bf16 %v47_v59, %v40_v58  ;;  %710 = vmatprep.subr.bf16.mxu1 %v721_v61  ;;  %v722_v62 = vld [vmem:[%s1199_s3 + $0x8] sm:$0xff]   ;;  %v586_v0 = vld [vmem:[%s1198_s2] ss:$0 sm:$0xff] }
  0x2c   :  { %266 = vmatmul.mubr.bf16.gmra.mrb[4].mxu0 %v57_v14  ;;  %v62_v57 = vpack.c.bf16 %v48_v55, %v41_v54 }
  0x2d   :  { %674 = vmatpush3.bf16.msra.mxu0 %v196_v16  ;;  %355 = vmatprep.mubr.bf16.mxu0 %v55_v17 }
  0x2e   :  { %675 = vmatprep.subr.bf16.mxu0 %v205_v19  ;;  %315 = vmatmul.mubr.bf16.gmra.mrb[4].mxu1 %v59_v23 }
  0x2f   :  { %706 = vmatprep.mubr.msk.bf16.mxu1 %vm218_vm0, %v56_v25 }
  0x31   :  { %676 = vmatpush3.bf16.msra.mxu0 %v197_v26 }
  0x32   :  { %677 = vmatprep.subr.bf16.mxu0 %v206_v27 }
  0x35   :  { %678 = vmatpush3.bf16.msra.mxu0 %v198_v34 }
  0x36   :  { %679 = vmatprep.subr.bf16.mxu0 %v207_v35  ;;  %707 = vmatmul.mubr.msk.bf16.vlgmr.msra.gmra.mrb[8].mxu1 %vm218_vm0, %v63_v38 }
  0x37   :  { %711 = vmatpush3.bf16.msra.mxu1 %v721_v61 }
  0x38   :  { %712 = vmatprep.subr.bf16.mxu1 %v722_v62 }
  0x39   :  { %680 = vmatpush3.bf16.msra.mxu0 %v199_v41 }
  0x3a   :  { %681 = vmatprep.subr.bf16.mxu0 %v208_v42 }
  0x3b   :  { %713 = vmatpush3.bf16.msra.mxu1 %v722_v62  ;;  %v589_v62 = vld [vmem:[%s1200_s4] ss:$0 sm:$0xff] }
  0x3d   :  { %682 = vmatpush3.bf16.msra.mxu0 %v200_v47 }
  0x3e   :  { %683 = vmatprep.subr.bf16.mxu0 %v209_v48 }
  0x41   :  { %684 = vmatpush3.bf16.msra.mxu0 %v201_v51 }
  0x44   :  { %356 = vmatmul.mubr.bf16.vlgmr.msra.gmra.mrb[8].mxu0 %v54_v56 }
  0x45   :  { %363 = vmatprep.mubr.bf16.mxu0 %v62_v57 }
  0x4c   :  { %364 = vmatmul.mubr.bf16.gmra.mrb[12].mxu0 %v61_v60 }
  0xf7   :  { %v629_v63 = vpop.f32.mrb[0].mxu0 }
  0xf8   :  { %v630_v1 = vpop.f32.mrb[1].mxu0 }
  0xf9   :  { %v631_v2 = vadd.f32 %v630_v1, %v629_v63  ;;  %v632_v3 = vpop.f32.mrb[2].mxu0  ;;  %v657_v4 = vpop.f32.mrb[0].mxu1 }
  0xfa   :  { %v633_v5 = vpop.f32.mrb[3].mxu0  ;;  %v658_v6 = vpop.f32.mrb[1].mxu1 }
  0xfb   :  { %v260_v7 = vadd.f32 %v631_v2, %v586_v0  ;;  %v634_v8 = vadd.f32 %v633_v5, %v632_v3  ;;  %v659_v9 = vadd.f32 %v658_v6, %v657_v4  ;;  %v660_v10 = vpop.f32.mrb[2].mxu1 }
  0xfc   :  { %v661_v11 = vpop.f32.mrb[3].mxu1 }
  0xfd   :  { %v263_v12 = vadd.f32 %v634_v8, %v586_v0  ;;  %v309_v13 = vadd.f32 %v659_v9, %v260_v7  ;;  %v662_v14 = vadd.f32 %v661_v11, %v660_v10 }
  0xff   :  { %v312_v15 = vadd.f32 %v662_v14, %v263_v12  ;;  %v635_v16 = vpop.f32.mrb[4].mxu0 }
 0x100   :  { %v636_v17 = vpop.f32.mrb[5].mxu0 }
 0x101   :  { %v637_v18 = vadd.f32 %v636_v17, %v635_v16  ;;  %v638_v19 = vpop.f32.mrb[6].mxu0  ;;  %v663_v20 = vpop.f32.mrb[4].mxu1 }
 0x102   :  { %v639_v21 = vpop.f32.mrb[7].mxu0  ;;  %v664_v22 = vpop.f32.mrb[5].mxu1 }
 0x103   :  { %v268_v23 = vadd.f32 %v637_v18, %v586_v0  ;;  %v640_v24 = vadd.f32 %v639_v21, %v638_v19  ;;  %v665_v25 = vadd.f32 %v664_v22, %v663_v20  ;;  %v666_v26 = vpop.f32.mrb[6].mxu1 }
 0x104   :  { %v667_v27 = vpop.f32.mrb[7].mxu1 }
 0x105   :  { %v271_v28 = vadd.f32 %v640_v24, %v586_v0  ;;  %v317_v29 = vadd.f32 %v665_v25, %v268_v23  ;;  %v668_v30 = vadd.f32 %v667_v27, %v666_v26 }
 0x107   :  { %v320_v31 = vadd.f32 %v668_v30, %v271_v28 }
 0x109   :  { %v708_v32 = vpop.f32.mrb[8].mxu1 }
 0x10a   :  { %v406_v33 = vpop.f32.mrb[9].mxu1 }
 0x10b   :  { %v709_v34 = vpop.f32.mrb[10].mxu1 }
 0x10c   :  { %v409_v35 = vpop.f32.mrb[11].mxu1 }
 0x117   :  { %v685_v36 = vpop.f32.mrb[8].mxu0 }
 0x118   :  { %v686_v37 = vpop.f32.mrb[9].mxu0 }
 0x119   :  { %v687_v38 = vadd.f32 %v686_v37, %v685_v36  ;;  %v688_v39 = vpop.f32.mrb[10].mxu0 }
 0x11a   :  { %v689_v40 = vpop.f32.mrb[11].mxu0 }
 0x11b   :  { %v690_v41 = vadd.f32 %v689_v40, %v688_v39  ;;  %v358_v42 = vadd.f32 %v687_v38, %v309_v13 }
 0x11d   :  { %v407_v43 = vadd.f32 %v406_v33, %v358_v42  ;;  %v361_v44 = vadd.f32 %v690_v41, %v312_v15 }
 0x11f   :  { %v410_v45 = vadd.f32 %v409_v35, %v361_v44  ;;  %v691_v46 = vpop.f32.mrb[12].mxu0  ;;  %v421_v48 = vmax.f32 %v407_v43, 0.0 }
 0x120   :  { %v692_v47 = vpop.f32.mrb[13].mxu0 }
 0x121   :  { %v422_v49 = vmax.f32 %v410_v45, 0.0  ;;  %v693_v50 = vadd.f32 %v692_v47, %v691_v46  ;;  %v694_v51 = vpop.f32.mrb[14].mxu0 }
 0x122   :  { %v695_v52 = vpop.f32.mrb[15].mxu0 }
 0x123   :  { %v425_v53 = vpack.c.bf16 %v422_v49, %v421_v48  ;;  %v366_v54 = vadd.f32 %v693_v50, %v317_v29  ;;  %v696_v55 = vadd.f32 %v695_v52, %v694_v51 }
 0x125   :  { %v415_v56 = vadd.f32 %v708_v32, %v366_v54  ;;  %v369_v57 = vadd.f32 %v696_v55, %v320_v31  ;;  %714 = vmatprep.mubr.msk.bf16.mxu1 %vm450_vm1, %v425_v53 }
 0x127   :  { %v418_v58 = vadd.f32 %v709_v34, %v369_v57  ;;  %v423_v59 = vmax.f32 %v415_v56, 0.0 }
 0x129   :  { %v424_v60 = vmax.f32 %v418_v58, 0.0 }
 0x12b   :  { %v426_v61 = vpack.c.bf16 %v424_v60, %v423_v59 }
 0x12d   :  { %715 = vmatmul.mubr.msk.bf16.vlgmr.msra.gmra.mrb[12].mxu1 %vm450_vm1, %v426_v61 }
 0x200   :  { %v716_v63 = vpop.f32.mrb[12].mxu1 }
 0x201   :  { %v500_v0 = vadd.f32 %v716_v63, %v589_v62  ;;  %v491_v1 = vpop.f32.mrb[13].mxu1 }
 0x202   :  { %v492_v2 = vadd.f32 %v589_v62, %v491_v1  ;;  %v717_v3 = vpop.f32.mrb[14].mxu1 }
 0x203   :  { %510 = vmax.xlane.f32.xlu1 %v500_v0  ;;  %v494_v4 = vpop.f32.mrb[15].mxu1  ;;  %v503_v5 = vadd.f32 %v717_v3, %v589_v62 }
 0x204   :  { %506 = vmax.xlane.f32.xlu0 %v492_v2  ;;  %v495_v6 = vadd.f32 %v589_v62, %v494_v4 }
 0x207   :  { %512 = vmax.xlane.f32.xlu1 %v503_v5 }
 0x208   :  { %508 = vmax.xlane.f32.xlu0 %v495_v6 }
 0x290   :  { %v511_v7 = vpop.xlane.xlu1 %510 }
 0x291   :  { %v507_v8 = vpop.xlane.xlu0 %506  ;;  %v516_v10 = vsub.f32 %v500_v0, %v511_v7 }
 0x292   :  { %v514_v13 = vsub.f32 %v492_v2, %v507_v8 }
 0x294   :  { %v513_v9 = vpop.xlane.xlu1 %512 }
 0x295   :  { %v517_v11 = vsub.f32 %v503_v5, %v513_v9  ;;  %v509_v12 = vpop.xlane.xlu0 %508 }
 0x296   :  { %v515_v14 = vsub.f32 %v495_v6, %v509_v12 }
 0x297   :  { %v519_v15 = vpack.c.bf16 %v517_v11, %v516_v10 }
 0x298   :  { %v518_v16 = vpack.c.bf16 %v515_v14, %v514_v13 }
 0x299   :  { %v524_v17 = vmul.bf16 1069105081, %v519_v15 }
 0x29a   :  { %v521_v18 = vmul.bf16 1069105081, %v518_v16 }
 0x29c   :  { %723 = vpow.bf16 %v521_v18 }
 0x29d   :  { %725 = vpow.bf16 %v524_v17 }
 0x2a7   :  { %v724_v19 = vpop.eup %723 }
 0x2a8   :  { %v527_v20 = vunpack.c.h.bf16 %v724_v19  ;;  %v526_v21 = vunpack.c.l.bf16 %v724_v19  ;;  %v726_v22 = vpop.eup %725 }
 0x2a9   :  { %v529_v23 = vunpack.c.h.bf16 %v726_v22  ;;  %v528_v24 = vunpack.c.l.bf16 %v726_v22 }
 0x2aa   :  { %532 = vadd.xlane.f32.xlu1 %v527_v20  ;;  %530 = vadd.xlane.f32.xlu0 %v526_v21 }
 0x2ae   :  { %536 = vadd.xlane.f32.xlu1 %v529_v23  ;;  %534 = vadd.xlane.f32.xlu0 %v528_v24 }
 0x337   :  { %v533_v25 = vpop.xlane.xlu1 %532  ;;  %v531_v26 = vpop.xlane.xlu0 %530 }
 0x338   :  { %727 = vlog2.f32 %v533_v25 }
 0x339   :  { %729 = vlog2.f32 %v531_v26 }
 0x33b   :  { %v537_v27 = vpop.xlane.xlu1 %536  ;;  %v535_v28 = vpop.xlane.xlu0 %534 }
 0x33c   :  { %731 = vlog2.f32 %v537_v27 }
 0x33d   :  { %733 = vlog2.f32 %v535_v28 }
 0x342   :  { %v728_v29 = vpop.eup %727 }
 0x343   :  { %v730_v30 = vpop.eup %729  ;;  %v541_v31 = vmul.f32 0.6931472, %v728_v29 }
 0x344   :  { %v539_v32 = vmul.f32 0.6931472, %v730_v30 }
 0x345   :  { %v547_v33 = vsub.f32 %v515_v14, %v541_v31 }
 0x346   :  { %v732_v34 = vpop.eup %731  ;;  %v546_v35 = vsub.f32 %v514_v13, %v539_v32 }
 0x347   :  { %v734_v36 = vpop.eup %733  ;;  %v545_v37 = vmul.f32 0.6931472, %v732_v34 }
 0x348   :  { %v605_v38 = vpack.c.bf16 %v547_v33, %v546_v35  ;;  %v543_v39 = vmul.f32 0.6931472, %v734_v36 }
 0x349   :  { %v549_v40 = vsub.f32 %v517_v11, %v545_v37 }
 0x34a   :  { %606 = vst [vmem:[#allocation2] sm:$0xff] %v605_v38   ;;  %v548_v41 = vsub.f32 %v516_v10, %v543_v39 }
 0x34c   :  { %v610_v42 = vpack.c.bf16 %v549_v40, %v548_v41 }
 0x34e   :  { %612 = vst [vmem:[#allocation2 + $0x8] sm:$0xff] %v610_v42  }
 0x34f   :  { %574 = vsyncadd [#allocation3], 192  ;;  %s759_s3 = smov [#allocation2]  }
 0x350   :  { %s575_s4 = sshll.u32 %s759_s3, 4  ;;  %s576_s4 = int_to_ptr.vmem [resolvable:$true] %s575_s4 }
 0x351   :  { %s735_s25 = scalar_lea.vmem %s576_s4, 64  ;;  %s739_s26 = scalar_lea.vmem %s576_s4, 256 }
 0x352   :  { %p736_p0 = scmp.ne.s32.totalorder %s576_s4, %s735_s25  ;;  %p740_p1 = scmp.lt.s32.totalorder %s576_s4, %s576_s4 }
 0x353   :  { %p741_p2 = scmp.lt.s32.totalorder %s739_s26, %s735_s25 }
 0x355   :  { %p742_p3 = por %p741_p2, %p740_p1 }
 0x357   :  { %p743_p4 = pnand %p742_p3, %p736_p0 }
 0x359   :  { %746 = shalt.err (!%p743_p4)
}
 0x35a   :  { %s747_s29 = scalar_lea.hbm %s1201_s5, 64 }
 0x35b   :  { %p748_p5 = scmp.ne.s32.totalorder %s1201_s5, %s747_s29  ;;  %p751_p6 = scmp.lt.u32.totalorder %s747_s29, %s1201_s5 }
 0x35d   :  { %p753_p7 = pnand %p751_p6, %p748_p5 }
 0x35f   :  { %756 = shalt.err (!%p753_p7)
}
 0x360   :  { %s760_s9 = smov 64   ;;  %s761_s10 = smov 4  }
 0x361   :  { %581 = dma.vmem_to_hbm [thread:$0]  %s576_s4, 64, %s1201_s5, [#allocation3], %s760_s9, %s760_s9, %s761_s10  }
 0x362   :  { %757 = dma.done.wait [#allocation3], 256  }
 0x363   :  { %758 = vsyncadd [#allocation3], 4294967040 }
 0x364   :  { %585 = vsyncpa [#allocation3], 1 }

</bundles_post_ra>
